<compile_context>
chip_gen: v6e
topology: v6e:2x2x1
jax: 0.10.0
libtpu: 0.0.40
codegen_flags: <defaults>
</compile_context>

<pallas_src>
import math

import jax
import jax.numpy as jnp
from jax.experimental import pallas as pl
from jax.experimental.pallas import tpu as pltpu  # noqa: F401  (kept for TPU-specific tuning hooks)

B, L, E = 2, 8, 32          # batch, sequence, embed_dim
INNER = 4 * E               # inner_dim = 4 * embed_dim (PyTorch default) = 128
EPS = 1e-5                  # nn.LayerNorm default eps
R = B * L                   # rows processed in the single grid-less step = 16


def _layernorm_f32(x, gamma, beta):
    # Fused single-pass LN: the two reductions (sum x, sum x*x) are independent so they can overlap
    # on the XLU; var = E[x^2] - mu^2 (clamped for safety), rsqrt goes to the EUP.
    inv_n = 1.0 / x.shape[-1]
    mu = jnp.sum(x, axis=-1, keepdims=True) * inv_n
    ms = jnp.sum(x * x, axis=-1, keepdims=True) * inv_n
    var = jnp.maximum(ms - mu * mu, 0.0)
    return (x - mu) * jax.lax.rsqrt(var + EPS) * gamma + beta


def feedforward_kernel(
    x_ref,      # (R, E)      f32   all B*L rows at once
    w1_ref,     # (E, INNER)  bf16  pre-transposed first Linear weight:  h = x @ W1
    b1_ref,     # (1, INNER)  f32   first Linear bias
    w2_ref,     # (INNER, E)  bf16  pre-transposed second Linear weight: y = h @ W2
    vecs_ref,   # (8, E)      f32   packed rows: [gamma1, beta1, gamma2, beta2, bias2, 0, 0, 0]
    out_ref,    # (R, E)      f32
):
    x = x_ref[...]
    g1 = vecs_ref[0:1, :]
    be1 = vecs_ref[1:2, :]
    g2 = vecs_ref[2:3, :]
    be2 = vecs_ref[3:4, :]
    b2 = vecs_ref[4:5, :]

    # LayerNorm -> Linear(E, 4E)   (bf16 MXU inputs, f32 accumulation)
    h = _layernorm_f32(x, g1, be1)
    h = jnp.dot(h.astype(jnp.bfloat16), w1_ref[...],
                preferred_element_type=jnp.float32) + b1_ref[...]

    # SquaredReLU
    h = jnp.maximum(h, 0.0)
    h = h * h

    # Linear(4E, E) -> LayerNorm
    y = jnp.dot(h.astype(jnp.bfloat16), w2_ref[...],
                preferred_element_type=jnp.float32) + b2
    out_ref[...] = _layernorm_f32(y, g2, be2)


def feedforward(x, params):
    w1_t, b1, w2_t, vecs = params
    x2d = x.reshape(R, E)
    # Grid-less invocation: one kernel step, every operand resident in VMEM as a full-array block,
    # exactly one DMA per input/output.
    out2d = pl.pallas_call(
        feedforward_kernel,
        out_shape=jax.ShapeDtypeStruct((R, E), jnp.float32),
    )(x2d, w1_t, b1, w2_t, vecs)
    return out2d.reshape(B, L, E)


def make_params(key):
    ks = jax.random.split(key, 8)
    g1 = 1.0 + 0.1 * jax.random.normal(ks[0], (E,), jnp.float32)
    be1 = 0.1 * jax.random.normal(ks[1], (E,), jnp.float32)
    w1_t = jax.random.normal(ks[2], (E, INNER), jnp.float32) / math.sqrt(E)
    b1 = 0.1 * jax.random.normal(ks[3], (1, INNER), jnp.float32)
    w2_t = jax.random.normal(ks[4], (INNER, E), jnp.float32) / math.sqrt(INNER)
    b2 = 0.1 * jax.random.normal(ks[5], (E,), jnp.float32)
    g2 = 1.0 + 0.1 * jax.random.normal(ks[6], (E,), jnp.float32)
    be2 = 0.1 * jax.random.normal(ks[7], (E,), jnp.float32)

    # Pack all E-wide vectors into one (8, E) array (one sublane tile, one DMA).
    vecs = jnp.zeros((8, E), jnp.float32)
    vecs = vecs.at[0].set(g1).at[1].set(be1).at[2].set(g2).at[3].set(be2).at[4].set(b2)

    kernel_params = (w1_t.astype(jnp.bfloat16), b1, w2_t.astype(jnp.bfloat16), vecs)
    f32_params = (w1_t, b1, w2_t, vecs)
    return kernel_params, f32_params


def reference(x, params, cast_matmul_inputs_to_bf16):
    """Plain-JAX mirror of the PyTorch FeedForward.forward.

    With cast_matmul_inputs_to_bf16=True it mirrors the kernel's precision policy
    (bf16 MXU inputs, f32 accumulation, f32 LayerNorm); with False it is the pure-f32 module."""
    w1_t, b1, w2_t, vecs = params
    g1, be1, g2, be2, b2 = vecs[0], vecs[1], vecs[2], vecs[3], vecs[4]

    def ln(t, g, b):
        mu = t.mean(-1, keepdims=True)
        var = ((t - mu) ** 2).mean(-1, keepdims=True)
        return (t - mu) / jnp.sqrt(var + EPS) * g + b

    def dot(a, w):
        if cast_matmul_inputs_to_bf16:
            a = a.astype(jnp.bfloat16)
            w = w.astype(jnp.bfloat16)
        return jnp.dot(a, w, preferred_element_type=jnp.float32)

    h = ln(x, g1, be1)
    h = dot(h, w1_t) + b1[0]
    h = jnp.maximum(h, 0.0) ** 2
    y = dot(h, w2_t) + b2
    return ln(y, g2, be2)


if __name__ == "__main__":
    key = jax.random.PRNGKey(0)
    kx, kp = jax.random.split(key)
    x = jax.random.normal(kx, (B, L, E), dtype=jnp.float32)
    kernel_params, f32_params = make_params(kp)

    out = feedforward(x, kernel_params)
    out = jax.block_until_ready(out)
    assert out.shape == (B, L, E)

    # (1) Strict check: kernel matches a plain-JAX mirror of its own precision policy
    #     (bf16 matmul inputs, f32 accumulation, f32 LayerNorm).
    ref_mixed = reference(x, kernel_params, cast_matmul_inputs_to_bf16=True)
    err_mixed = float(jnp.max(jnp.abs(out - ref_mixed)))
    assert jnp.allclose(out, ref_mixed, atol=1e-4, rtol=1e-4), f"mixed-precision max abs err = {err_mixed}"

    # (2) Semantics check vs. the full-f32 PyTorch FeedForward math; the only deviation is the
    #     bf16 weight/activation quantization inside the two matmuls.
    ref_f32 = reference(x, f32_params, cast_matmul_inputs_to_bf16=False)
    err_f32 = float(jnp.max(jnp.abs(out - ref_f32)))
    assert err_f32 < 1e-1, f"bf16-weight deviation too large: max abs err = {err_f32}"

    print("KERNEL_OK")
</pallas_src>

<mosaic_0001>
module attributes {stable_mosaic.version = 11 : i64} {
  func.func @feedforward_kernel(%arg0: memref<16x32xf32, #tpu.memory_space<vmem>>, %arg1: memref<32x128xbf16, #tpu.memory_space<vmem>>, %arg2: memref<1x128xf32, #tpu.memory_space<vmem>>, %arg3: memref<128x32xbf16, #tpu.memory_space<vmem>>, %arg4: memref<8x32xf32, #tpu.memory_space<vmem>>, %arg5: memref<16x32xf32, #tpu.memory_space<vmem>>) attributes {dimension_semantics = [], scalar_prefetch = 0 : i64, scratch_operands = 0 : i64, tpu.core_type = #tpu.core_type<tc>} {
    %c0 = arith.constant 0 : index
    %c0_0 = arith.constant 0 : index
    %0 = vector.load %arg0[%c0, %c0_0] : memref<16x32xf32, #tpu.memory_space<vmem>>, vector<16x32xf32>
    %c0_1 = arith.constant 0 : index
    %c0_2 = arith.constant 0 : index
    %1 = vector.load %arg4[%c0_1, %c0_2] : memref<8x32xf32, #tpu.memory_space<vmem>>, vector<1x32xf32>
    %c1 = arith.constant 1 : index
    %c0_3 = arith.constant 0 : index
    %2 = vector.load %arg4[%c1, %c0_3] : memref<8x32xf32, #tpu.memory_space<vmem>>, vector<1x32xf32>
    %c2 = arith.constant 2 : index
    %c0_4 = arith.constant 0 : index
    %3 = vector.load %arg4[%c2, %c0_4] : memref<8x32xf32, #tpu.memory_space<vmem>>, vector<1x32xf32>
    %c3 = arith.constant 3 : index
    %c0_5 = arith.constant 0 : index
    %4 = vector.load %arg4[%c3, %c0_5] : memref<8x32xf32, #tpu.memory_space<vmem>>, vector<1x32xf32>
    %c4 = arith.constant 4 : index
    %c0_6 = arith.constant 0 : index
    %5 = vector.load %arg4[%c4, %c0_6] : memref<8x32xf32, #tpu.memory_space<vmem>>, vector<1x32xf32>
    %cst = arith.constant dense<0.000000e+00> : vector<16xf32>
    %6 = vector.multi_reduction <add>, %0, %cst [1] : vector<16x32xf32> to vector<16xf32>
    %7 = vector.shape_cast %6 : vector<16xf32> to vector<16x1xf32>
    %cst_7 = arith.constant 3.125000e-02 : f32
    %8 = vector.broadcast %cst_7 : f32 to vector<16x1xf32>
    %9 = arith.mulf %7, %8 : vector<16x1xf32>
    %10 = arith.mulf %0, %0 : vector<16x32xf32>
    %cst_8 = arith.constant dense<0.000000e+00> : vector<16xf32>
    %11 = vector.multi_reduction <add>, %10, %cst_8 [1] : vector<16x32xf32> to vector<16xf32>
    %12 = vector.shape_cast %11 : vector<16xf32> to vector<16x1xf32>
    %cst_9 = arith.constant 3.125000e-02 : f32
    %13 = vector.broadcast %cst_9 : f32 to vector<16x1xf32>
    %14 = arith.mulf %12, %13 : vector<16x1xf32>
    %15 = arith.mulf %9, %9 : vector<16x1xf32>
    %16 = arith.subf %14, %15 : vector<16x1xf32>
    %cst_10 = arith.constant 0.000000e+00 : f32
    %17 = vector.broadcast %cst_10 : f32 to vector<16x1xf32>
    %18 = arith.maximumf %16, %17 : vector<16x1xf32>
    %19 = vector.broadcast %9 : vector<16x1xf32> to vector<16x32xf32>
    %20 = arith.subf %0, %19 : vector<16x32xf32>
    %cst_11 = arith.constant 9.99999974E-6 : f32
    %21 = vector.broadcast %cst_11 : f32 to vector<16x1xf32>
    %22 = arith.addf %18, %21 : vector<16x1xf32>
    %23 = math.rsqrt %22 : vector<16x1xf32>
    %24 = vector.broadcast %23 : vector<16x1xf32> to vector<16x32xf32>
    %25 = arith.mulf %20, %24 : vector<16x32xf32>
    %26 = vector.broadcast %1 : vector<1x32xf32> to vector<16x32xf32>
    %27 = arith.mulf %25, %26 : vector<16x32xf32>
    %28 = vector.broadcast %2 : vector<1x32xf32> to vector<16x32xf32>
    %29 = arith.addf %27, %28 : vector<16x32xf32>
    %30 = arith.truncf %29 : vector<16x32xf32> to vector<16x32xbf16>
    %c0_12 = arith.constant 0 : index
    %c0_13 = arith.constant 0 : index
    %31 = vector.load %arg1[%c0_12, %c0_13] : memref<32x128xbf16, #tpu.memory_space<vmem>>, vector<32x128xbf16>
    %cst_14 = arith.constant dense<0.000000e+00> : vector<16x128xf32>
    %32 = tpu.matmul %30, %31, %cst_14 {dimension_numbers = #tpu.dot_dimension_numbers<[1], [0], [0], [1], [0, 0, 1, 1], [], []>} : vector<16x32xbf16>, vector<32x128xbf16>, vector<16x128xf32> -> vector<16x128xf32>
    %c0_15 = arith.constant 0 : index
    %c0_16 = arith.constant 0 : index
    %33 = vector.load %arg2[%c0_15, %c0_16] : memref<1x128xf32, #tpu.memory_space<vmem>>, vector<1x128xf32>
    %34 = vector.broadcast %33 : vector<1x128xf32> to vector<16x128xf32>
    %35 = arith.addf %32, %34 : vector<16x128xf32>
    %cst_17 = arith.constant 0.000000e+00 : f32
    %36 = vector.broadcast %cst_17 : f32 to vector<16x128xf32>
    %37 = arith.maximumf %35, %36 : vector<16x128xf32>
    %38 = arith.mulf %37, %37 : vector<16x128xf32>
    %39 = arith.truncf %38 : vector<16x128xf32> to vector<16x128xbf16>
    %c0_18 = arith.constant 0 : index
    %c0_19 = arith.constant 0 : index
    %40 = vector.load %arg3[%c0_18, %c0_19] : memref<128x32xbf16, #tpu.memory_space<vmem>>, vector<128x32xbf16>
    %cst_20 = arith.constant dense<0.000000e+00> : vector<16x32xf32>
    %41 = tpu.matmul %39, %40, %cst_20 {dimension_numbers = #tpu.dot_dimension_numbers<[1], [0], [0], [1], [0, 0, 1, 1], [], []>} : vector<16x128xbf16>, vector<128x32xbf16>, vector<16x32xf32> -> vector<16x32xf32>
    %42 = vector.broadcast %5 : vector<1x32xf32> to vector<16x32xf32>
    %43 = arith.addf %41, %42 : vector<16x32xf32>
    %cst_21 = arith.constant dense<0.000000e+00> : vector<16xf32>
    %44 = vector.multi_reduction <add>, %43, %cst_21 [1] : vector<16x32xf32> to vector<16xf32>
    %45 = vector.shape_cast %44 : vector<16xf32> to vector<16x1xf32>
    %cst_22 = arith.constant 3.125000e-02 : f32
    %46 = vector.broadcast %cst_22 : f32 to vector<16x1xf32>
    %47 = arith.mulf %45, %46 : vector<16x1xf32>
    %48 = arith.mulf %43, %43 : vector<16x32xf32>
    %cst_23 = arith.constant dense<0.000000e+00> : vector<16xf32>
    %49 = vector.multi_reduction <add>, %48, %cst_23 [1] : vector<16x32xf32> to vector<16xf32>
    %50 = vector.shape_cast %49 : vector<16xf32> to vector<16x1xf32>
    %cst_24 = arith.constant 3.125000e-02 : f32
    %51 = vector.broadcast %cst_24 : f32 to vector<16x1xf32>
    %52 = arith.mulf %50, %51 : vector<16x1xf32>
    %53 = arith.mulf %47, %47 : vector<16x1xf32>
    %54 = arith.subf %52, %53 : vector<16x1xf32>
    %cst_25 = arith.constant 0.000000e+00 : f32
    %55 = vector.broadcast %cst_25 : f32 to vector<16x1xf32>
    %56 = arith.maximumf %54, %55 : vector<16x1xf32>
    %57 = vector.broadcast %47 : vector<16x1xf32> to vector<16x32xf32>
    %58 = arith.subf %43, %57 : vector<16x32xf32>
    %cst_26 = arith.constant 9.99999974E-6 : f32
    %59 = vector.broadcast %cst_26 : f32 to vector<16x1xf32>
    %60 = arith.addf %56, %59 : vector<16x1xf32>
    %61 = math.rsqrt %60 : vector<16x1xf32>
    %62 = vector.broadcast %61 : vector<16x1xf32> to vector<16x32xf32>
    %63 = arith.mulf %58, %62 : vector<16x32xf32>
    %64 = vector.broadcast %3 : vector<1x32xf32> to vector<16x32xf32>
    %65 = arith.mulf %63, %64 : vector<16x32xf32>
    %66 = vector.broadcast %4 : vector<1x32xf32> to vector<16x32xf32>
    %67 = arith.addf %65, %66 : vector<16x32xf32>
    %c0_27 = arith.constant 0 : index
    %c0_28 = arith.constant 0 : index
    %68 = vector.load %arg5[%c0_27, %c0_28] : memref<16x32xf32, #tpu.memory_space<vmem>>, vector<16x32xf32>
    tpu.vector_store %arg5[%c0_27, %c0_28], %67 {strides = array<i32>} : memref<16x32xf32, #tpu.memory_space<vmem>>, vector<16x32xf32>,
    return
  }
}

</mosaic_0001>

<bundles_post_ra>
// kernel: tpu_custom_call.1
= control target key start
LH: loop header
LB: loop body
LE: loop exit
PB: predicated region body
PF: predicated region fallthrough
CT: control target
= control target key end

     0   :  { %vm29_vm0 = vcmask 261120   ;;  %s529_s0 = inlined_call_operand.vmem [shape: f32[16,32], index: 0, kind: input, shape index: {}]   ;;  %s530_s1 = inlined_call_operand.vmem [shape: bf16[32,128], index: 1, kind: input, shape index: {}]   ;;  %s531_s2 = inlined_call_operand.vmem [shape: f32[1,128], index: 2, kind: input, shape index: {}]   ;;  %s532_s3 = inlined_call_operand.vmem [shape: bf16[128,32], index: 3, kind: input, shape index: {}]   ;;  %s533_s4 = inlined_call_operand.vmem [shape: f32[8,32], index: 4, kind: input, shape index: {}]   ;;  %s534_s5 = inlined_call_operand.hbm [shape: f32[16,32], index: 5, kind: output, shape index: {}]  }
   0x1   :  { %v22_v0 = vld [vmem:[%s529_s0] sm:$0xff]  ;;  %v461_v1 = vld [vmem:[%s529_s0 + $0x8] sm:$0xff] }
   0x2   :  { %v30_v2 = vsel %vm29_vm0, %v22_v0, 0.0  ;;  %v38_v3 = vmul.f32 %v22_v0, %v22_v0  ;;  %v33_v4 = vsel %vm29_vm0, %v461_v1, 0.0  ;;  %v39_v5 = vmul.f32 %v461_v1, %v461_v1 }
   0x3   :  { %31 = vadd.xlane.f32.xlu0 %v30_v2 }
   0x4   :  { %v40_v6 = vsel %vm29_vm0, %v38_v3, 0.0  ;;  %v43_v7 = vsel %vm29_vm0, %v39_v5, 0.0 }
   0x5   :  { %41 = vadd.xlane.f32.xlu1 %v40_v6 }
   0x7   :  { %34 = vadd.xlane.f32.xlu0 %v33_v4 }
   0x9   :  { %44 = vadd.xlane.f32.xlu1 %v43_v7 }
   0xa   :  { %10 = vsyncpa [#allocation3], 0  ;;  %v380_v8 = vld [vmem:[%s530_s1 + $0x8] sm:$0xff]   ;;  %v420_v9 = vmov 0.0   ;;  %vm421_vm1 = vmmov 0   ;;  %v381_v10 = vld [vmem:[%s530_s1] sm:$0xff]  }
   0xb   :  { %347 = vmatprep.subr.bf16.mxu0 %v420_v9  ;;  %351 = vmatprep.mubr.msk.bf16.mxu0 %vm421_vm1, %v420_v9  ;;  %v382_v11 = vld [vmem:[%s532_s3 + $0x38] sm:$0xff]   ;;  %v383_v12 = vld [vmem:[%s532_s3 + $0x30] sm:$0xff]   ;;  %v384_v13 = vld [vmem:[%s532_s3 + $0x28] sm:$0xff]   ;;  %s422_s24 = smov [#allocation2]  }
   0xc   :  { %348 = vmatpush3.bf16.msra.mxu0 %v380_v8  ;;  %355 = vmatprep.subr.bf16.mxu1 %v420_v9  ;;  %v385_v14 = vld [vmem:[%s532_s3 + $0x20] sm:$0xff]   ;;  %v386_v15 = vld [vmem:[%s532_s3 + $0x18] sm:$0xff]   ;;  %v387_v45 = vld [vmem:[%s532_s3 + $0x10] sm:$0xff]   ;;  %s307_s25 = sshll.u32 %s422_s24, 4  ;;  %s308_s25 = int_to_ptr.vmem [resolvable:$true] %s307_s25 }
   0xd   :  { %349 = vmatprep.subr.bf16.mxu0 %v420_v9  ;;  %371 = vmatprep.mubr.msk.bf16.mxu1 %vm421_vm1, %v420_v9  ;;  %v318_v35 = vld [vmem:[%s533_s4] ss:$0 sm:$0xff]  ;;  %v319_v40 = vld [vmem:[%s533_s4 + $0x1] ss:$0 sm:$0xff]  ;;  %v388_v46 = vld [vmem:[%s532_s3 + $0x8] sm:$0xff]   ;;  %s398_s26 = scalar_lea.vmem %s308_s25, 256  ;;  %p403_p1 = scmp.lt.s32.totalorder %s308_s25, %s308_s25 }
   0xe   :  { %356 = vmatpush3.bf16.msra.mxu1 %v382_v11  ;;  %v389_v47 = vld [vmem:[%s532_s3] sm:$0xff]   ;;  %p399_p0 = scmp.ne.s32.totalorder %s308_s25, %s398_s26  ;;  %p404_p2 = scmp.lt.s32.totalorder %s398_s26, %s398_s26 }
   0xf   :  { %357 = vmatprep.subr.bf16.mxu1 %v420_v9  ;;  %v320_v48 = vld [vmem:[%s531_s2] ss:$0 sm:$0xff]  ;;  %v324_v60 = vld [vmem:[%s533_s4 + $0x4] ss:$0 sm:$0xff] }
  0x10   :  { %350 = vmatpush3.bf16.msra.mxu0 %v381_v10  ;;  %p405_p3 = por %p404_p2, %p403_p1 }
  0x12   :  { %358 = vmatpush3.bf16.msra.mxu1 %v383_v12  ;;  %p406_p4 = pnand %p405_p3, %p399_p0 }
  0x13   :  { %359 = vmatprep.subr.bf16.mxu1 %v420_v9 }
  0x16   :  { %360 = vmatpush3.bf16.msra.mxu1 %v384_v13 }
  0x17   :  { %361 = vmatprep.subr.bf16.mxu1 %v420_v9 }
  0x1a   :  { %362 = vmatpush3.bf16.msra.mxu1 %v385_v14 }
  0x1b   :  { %363 = vmatprep.subr.bf16.mxu1 %v420_v9 }
  0x1e   :  { %364 = vmatpush3.bf16.msra.mxu1 %v386_v15 }
  0x1f   :  { %365 = vmatprep.subr.bf16.mxu1 %v420_v9 }
  0x22   :  { %366 = vmatpush3.bf16.msra.mxu1 %v387_v45 }
  0x23   :  { %367 = vmatprep.subr.bf16.mxu1 %v420_v9 }
  0x26   :  { %368 = vmatpush3.bf16.msra.mxu1 %v388_v46 }
  0x27   :  { %369 = vmatprep.subr.bf16.mxu1 %v420_v9 }
  0x2a   :  { %370 = vmatpush3.bf16.msra.mxu1 %v389_v47 }
  0x8c   :  { %v32_v16 = vpop.xlane.xlu0 %31 }
  0x8d   :  { %v36_v17 = vmul.f32 0.03125, %v32_v16 }
  0x8e   :  { %v42_v18 = vpop.xlane.xlu1 %41 }
  0x8f   :  { %v48_v19 = vmul.f32 %v36_v17, %v36_v17  ;;  %v46_v20 = vmul.f32 0.03125, %v42_v18  ;;  %v54_v32 = vsub.f32 %v22_v0, %v36_v17 }
  0x90   :  { %v35_v21 = vpop.xlane.xlu0 %34 }
  0x91   :  { %v50_v22 = vsub.f32 %v46_v20, %v48_v19  ;;  %v37_v23 = vmul.f32 0.03125, %v35_v21 }
  0x92   :  { %v45_v24 = vpop.xlane.xlu1 %44 }
  0x93   :  { %v52_v25 = vmax.f32 %v50_v22, 0.0  ;;  %v49_v26 = vmul.f32 %v37_v23, %v37_v23  ;;  %v47_v27 = vmul.f32 0.03125, %v45_v24  ;;  %v55_v36 = vsub.f32 %v461_v1, %v37_v23 }
  0x95   :  { %v56_v28 = vadd.f32 1e-05, %v52_v25  ;;  %v51_v29 = vsub.f32 %v47_v27, %v49_v26  ;;  %v333_v27 = vld [vmem:[%s533_s4 + $0x2] ss:$0 sm:$0xff] }
  0x97   :  { %390 = vrsqrt.f32 %v56_v28  ;;  %v53_v30 = vmax.f32 %v51_v29, 0.0  ;;  %v334_v29 = vld [vmem:[%s533_s4 + $0x3] ss:$0 sm:$0xff] }
  0x99   :  { %v57_v31 = vadd.f32 1e-05, %v53_v30 }
  0x9b   :  { %392 = vrsqrt.f32 %v57_v31 }
  0xa4   :  { %v391_v33 = vpop.eup %390 }
  0xa5   :  { %v60_v34 = vmul.f32 %v391_v33, %v54_v32 }
  0xa7   :  { %v66_v39 = vmul.f32 %v318_v35, %v60_v34 }
  0xa8   :  { %v393_v37 = vpop.eup %392 }
  0xa9   :  { %v61_v38 = vmul.f32 %v393_v37, %v55_v36  ;;  %v72_v42 = vadd.f32 %v319_v40, %v66_v39 }
  0xab   :  { %v67_v41 = vmul.f32 %v318_v35, %v61_v38 }
  0xad   :  { %v73_v43 = vadd.f32 %v319_v40, %v67_v41 }
  0xaf   :  { %v74_v44 = vpack.c.bf16 %v73_v43, %v72_v42 }
  0xb1   :  { %352 = vmatmul.mubr.msk.bf16.vlgmr.msra.gmra.mxu0 %vm29_vm0, %v74_v44 }
 0x171   :  { %v135_v49 = vpop.f32.mrf.mxu0 }
 0x172   :  { %v136_v50 = vadd.f32 %v320_v48, %v135_v49 }
 0x173   :  { %v353_v51 = vpop.f32.mrf.mxu0 }
 0x174   :  { %v142_v53 = vmax.f32 %v136_v50, 0.0 }
 0x175   :  { %v138_v52 = vpop.f32.mrf.mxu0 }
 0x176   :  { %v139_v54 = vadd.f32 %v320_v48, %v138_v52  ;;  %v144_v57 = vmul.f32 %v142_v53, %v142_v53 }
 0x177   :  { %v354_v55 = vpop.f32.mrf.mxu0 }
 0x178   :  { %v143_v56 = vmax.f32 %v139_v54, 0.0 }
 0x17a   :  { %v145_v58 = vmul.f32 %v143_v56, %v143_v56 }
 0x17c   :  { %v146_v59 = vpack.c.bf16 %v145_v58, %v144_v57 }
 0x17e   :  { %372 = vmatmul.mubr.bf16.vlgmr.msra.gmra.mxu1 %v146_v59 }
 0x23e   :  { %v249_v61 = vpop.f32.mrf.mxu1 }
 0x23f   :  { %v250_v62 = vadd.f32 %v324_v60, %v249_v61 }
 0x240   :  { %v373_v63 = vpop.f32.mrf.mxu1 }
 0x241   :  { %v256_v0 = vsel %vm29_vm0, %v250_v62, 0.0  ;;  %v264_v1 = vmul.f32 %v250_v62, %v250_v62 }
 0x242   :  { %257 = vadd.xlane.f32.xlu0 %v256_v0  ;;  %v252_v2 = vpop.f32.mrf.mxu1 }
 0x243   :  { %v253_v3 = vadd.f32 %v324_v60, %v252_v2  ;;  %v266_v5 = vsel %vm29_vm0, %v264_v1, 0.0 }
 0x244   :  { %v374_v4 = vpop.f32.mrf.mxu1 }
 0x245   :  { %v259_v6 = vsel %vm29_vm0, %v253_v3, 0.0  ;;  %v265_v7 = vmul.f32 %v253_v3, %v253_v3 }
 0x246   :  { %267 = vadd.xlane.f32.xlu0 %v266_v5  ;;  %260 = vadd.xlane.f32.xlu1 %v259_v6 }
 0x247   :  { %v269_v8 = vsel %vm29_vm0, %v265_v7, 0.0 }
 0x24a   :  { %270 = vadd.xlane.f32.xlu1 %v269_v8 }
 0x2cb   :  { %v258_v9 = vpop.xlane.xlu0 %257 }
 0x2cc   :  { %v262_v10 = vmul.f32 0.03125, %v258_v9 }
 0x2ce   :  { %v274_v13 = vmul.f32 %v262_v10, %v262_v10  ;;  %v280_v25 = vsub.f32 %v250_v62, %v262_v10 }
 0x2cf   :  { %v268_v11 = vpop.xlane.xlu0 %267  ;;  %v261_v12 = vpop.xlane.xlu1 %260 }
 0x2d0   :  { %v272_v14 = vmul.f32 0.03125, %v268_v11  ;;  %v263_v15 = vmul.f32 0.03125, %v261_v12 }
 0x2d2   :  { %v276_v16 = vsub.f32 %v272_v14, %v274_v13  ;;  %v275_v19 = vmul.f32 %v263_v15, %v263_v15  ;;  %v281_v30 = vsub.f32 %v253_v3, %v263_v15 }
 0x2d3   :  { %v271_v17 = vpop.xlane.xlu1 %270 }
 0x2d4   :  { %v278_v18 = vmax.f32 %v276_v16, 0.0  ;;  %v273_v20 = vmul.f32 0.03125, %v271_v17 }
 0x2d6   :  { %v282_v21 = vadd.f32 1e-05, %v278_v18  ;;  %v277_v22 = vsub.f32 %v273_v20, %v275_v19 }
 0x2d8   :  { %394 = vrsqrt.f32 %v282_v21  ;;  %v279_v23 = vmax.f32 %v277_v22, 0.0 }
 0x2da   :  { %v283_v24 = vadd.f32 1e-05, %v279_v23 }
 0x2dc   :  { %396 = vrsqrt.f32 %v283_v24 }
 0x2e5   :  { %v395_v26 = vpop.eup %394 }
 0x2e6   :  { %v286_v28 = vmul.f32 %v395_v26, %v280_v25 }
 0x2e8   :  { %v292_v31 = vmul.f32 %v333_v27, %v286_v28 }
 0x2e9   :  { %v397_v32 = vpop.eup %396 }
 0x2ea   :  { %v287_v33 = vmul.f32 %v397_v32, %v281_v30  ;;  %v298_v34 = vadd.f32 %v334_v29, %v292_v31 }
 0x2ec   :  { %v293_v35 = vmul.f32 %v333_v27, %v287_v33  ;;  %300 = vst.msk [vmem:[#allocation2] sm:$0xff] %vm29_vm0, %v298_v34 }
 0x2ee   :  { %v299_v36 = vadd.f32 %v334_v29, %v293_v35 }
 0x2f0   :  { %301 = vst.msk [vmem:[#allocation2 + $0x8] sm:$0xff] %vm29_vm0, %v299_v36 }
 0x2f1   :  { %409 = shalt.err (!%p406_p4)
}
 0x2f2   :  { %s423_s4 = smov 128   ;;  %s424_s27 = smov 8  }
 0x2f3   :  { %313 = dma.vmem_to_hbm [thread:$0]  %s308_s25, 256, %s534_s5, [#allocation3], %s423_s4, %s423_s4, %s424_s27  }
 0x2f4   :  { %418 = dma.done.wait [#allocation3], 256  }
 0x2f5   :  { %419 = vsyncadd [#allocation3], 4294967040 }
 0x2f6   :  { %317 = vsyncpa [#allocation3], 1 }

</bundles_post_ra>
